<compile_context>
chip_gen: v6e
topology: v6e:2x2x1
jax: 0.10.0
libtpu: 0.0.40
codegen_flags: <defaults>
</compile_context>

<pallas_src>
import math
import jax
import jax.numpy as jnp
from jax.experimental import pallas as pl
from jax.experimental.pallas import tpu as pltpu


def make_dct_matrix(H: int, W: int) -> jnp.ndarray:
    """Replicates the PyTorch __init__ construction of dct_C (shape [H, W])."""
    N = W
    C = [[0.0] * W for _ in range(H)]
    for j in range(W):
        C[0][j] = math.sqrt(1.0 / N)
    for i in range(1, H):
        for j in range(W):
            # pi deliberately truncated to 3.1415926 to match the PyTorch module
            C[i][j] = math.cos(3.1415926 * i * (2 * j + 1) / (2.0 * N)) * math.sqrt(2.0 / N)
    return jnp.asarray(C, dtype=jnp.float32)


def _round_up(x: int, m: int) -> int:
    return ((x + m - 1) // m) * m


def _idct2d_kernel(k_ref, x_ref, y_ref):
    # k_ref: (HW, HW) Kronecker basis, resident in VMEM across all grid steps.
    # x_ref: (T, HW) chunk of flattened slabs; y_ref: (T, HW) output chunk.
    y_ref[...] = jnp.dot(
        x_ref[...], k_ref[...], preferred_element_type=jnp.float32
    ).astype(y_ref.dtype)


def idct2d(x: jnp.ndarray, dct_C: jnp.ndarray, *, block_rows: int = 2048) -> jnp.ndarray:
    """x: (B, C, H, W) float32 -> (B, C, H, W) float32, y[b,c] = C^T @ x[b,c] @ C."""
    B, Ch, H, W = x.shape
    assert H == W, "IDCT2d (as written in the PyTorch module) requires H == W"
    assert dct_C.shape == (H, W)

    HW = H * W
    n = B * Ch

    # K = kron(C, C): K[k*N+l, i*N+j] = C[k,i] * C[l,j]
    #   => (vec_r(X) @ K)[i*N+j] = sum_{k,l} X[k,l] C[k,i] C[l,j] = (C^T X C)[i,j]
    K = jnp.kron(dct_C, dct_C).astype(jnp.float32)          # (HW, HW)

    x_flat = x.reshape(n, HW).astype(jnp.float32)

    # Row-chunk size: multi-MiB tiles for HBM-roofline, but never below the
    # (8, 128)-tiling sublane multiple. 2048 rows * 256 cols * 4 B = 2 MiB/tile,
    # which fits comfortably in the default scoped VMEM on v5e/v6e/v7x even with
    # double-buffered inputs + outputs (~8.5 MiB total incl. the resident K).
    T = min(block_rows, _round_up(n, 8))
    n_pad = _round_up(n, T)
    if n_pad != n:
        x_flat = jnp.pad(x_flat, ((0, n_pad - n), (0, 0)))

    grid = (n_pad // T,)

    y_flat = pl.pallas_call(
        _idct2d_kernel,
        out_shape=jax.ShapeDtypeStruct((n_pad, HW), jnp.float32),
        grid=grid,
        in_specs=[
            pl.BlockSpec((HW, HW), lambda i: (0, 0)),   # K: full block, stays resident
            pl.BlockSpec((T, HW), lambda i: (i, 0)),    # x chunk: lane-dense (last dim 256)
        ],
        out_specs=pl.BlockSpec((T, HW), lambda i: (i, 0)),
        compiler_params=pltpu.CompilerParams(
            # Independent row-chunks: shard the grid across TensorCores (v7x).
            dimension_semantics=("parallel",),
        ),
    )(K, x_flat)

    return y_flat[:n].reshape(B, Ch, H, W).astype(x.dtype)


def idct2d_ref(x: jnp.ndarray, dct_C: jnp.ndarray) -> jnp.ndarray:
    """Pure-JAX reference: y[b,c] = C^T @ x[b,c] @ C."""
    return jnp.einsum("ki,bckl,lj->bcij", dct_C, x, dct_C)


if __name__ == "__main__":
    B, C, H, W = 2, 4, 16, 16
    key = jax.random.PRNGKey(0)
    x = jax.random.normal(key, (B, C, H, W), dtype=jnp.float32)

    dct_C = make_dct_matrix(H, W)

    y = idct2d(x, dct_C)
    y = jax.block_until_ready(y)

    y_ref = idct2d_ref(x, dct_C)
    assert y.shape == (B, C, H, W)
    assert jnp.allclose(y, y_ref, atol=1e-4, rtol=1e-4), "mismatch vs reference"

    print("KERNEL_OK")
</pallas_src>

<mosaic_0001>
module attributes {stable_mosaic.version = 11 : i64} {
  func.func @_idct2d_kernel(%arg0: i32, %arg1: memref<256x256xf32, #tpu.memory_space<vmem>>, %arg2: memref<8x256xf32, #tpu.memory_space<vmem>>, %arg3: memref<8x256xf32, #tpu.memory_space<vmem>>) attributes {dimension_semantics = [#tpu.dimension_semantics<parallel>], iteration_bounds = array<i64: 1>, scalar_prefetch = 0 : i64, scratch_operands = 0 : i64, tpu.core_type = #tpu.core_type<tc>, window_params = [{pipeline_mode = #tpu.pipeline_mode<synchronous>, transform_indices = @transform_0, window_bounds = array<i64: 256, 256>}, {transform_indices = @transform_1, window_bounds = array<i64: 8, 256>}, {transform_indices = @transform_2, window_bounds = array<i64: 8, 256>}]} {
    %c0 = arith.constant 0 : index
    %c0_0 = arith.constant 0 : index
    %0 = vector.load %arg2[%c0, %c0_0] : memref<8x256xf32, #tpu.memory_space<vmem>>, vector<8x256xf32>
    %c0_1 = arith.constant 0 : index
    %c0_2 = arith.constant 0 : index
    %1 = vector.load %arg1[%c0_1, %c0_2] : memref<256x256xf32, #tpu.memory_space<vmem>>, vector<256x256xf32>
    %cst = arith.constant dense<0.000000e+00> : vector<8x256xf32>
    %2 = tpu.matmul %0, %1, %cst {dimension_numbers = #tpu.dot_dimension_numbers<[1], [0], [0], [1], [0, 0, 1, 1], [], []>} : vector<8x256xf32>, vector<256x256xf32>, vector<8x256xf32> -> vector<8x256xf32>
    %c0_3 = arith.constant 0 : index
    %c0_4 = arith.constant 0 : index
    %3 = vector.load %arg3[%c0_3, %c0_4] : memref<8x256xf32, #tpu.memory_space<vmem>>, vector<8x256xf32>
    tpu.vector_store %arg3[%c0_3, %c0_4], %2 {strides = array<i32>} : memref<8x256xf32, #tpu.memory_space<vmem>>, vector<8x256xf32>,
    return
  }
  func.func @transform_0(%arg0: i32) -> (i32, i32) {
    %c0_i32 = arith.constant 0 : i32
    %c0_i32_0 = arith.constant 0 : i32
    %c0_i32_1 = arith.constant 0 : i32
    return %c0_i32, %c0_i32_0 : i32, i32
  }
  func.func @transform_1(%arg0: i32) -> (i32, i32) {
    %c0_i32 = arith.constant 0 : i32
    %c0_i32_0 = arith.constant 0 : i32
    return %arg0, %c0_i32 : i32, i32
  }
  func.func @transform_2(%arg0: i32) -> (i32, i32) {
    %c0_i32 = arith.constant 0 : i32
    %c0_i32_0 = arith.constant 0 : i32
    return %arg0, %c0_i32 : i32, i32
  }
}

</mosaic_0001>

<bundles_post_ra>
// kernel: tpu_custom_call.1
= control target key start
LH: loop header
LB: loop body
LE: loop exit
PB: predicated region body
PF: predicated region fallthrough
CT: control target
= control target key end

     0   :  { %7 = vsyncpa [#allocation3], 0  ;;  %s293_s0 = inlined_call_operand.hbm [shape: f32[256,256], index: 0, kind: input, shape index: {}]   ;;  %s294_s1 = inlined_call_operand.hbm [shape: f32[8,256], index: 1, kind: input, shape index: {}]   ;;  %s295_s2 = inlined_call_operand.hbm [shape: f32[8,256], index: 2, kind: output, shape index: {}]  }
   0x1   :  { %8 = vsyncpa [#allocation6], 0 }
   0x2   :  { %9 = vsyncpa [#allocation4], 0  ;;  %s264_s9 = smov [#allocation2]  }
   0x3   :  { %s15_s10 = sshll.u32 %s264_s9, 4  ;;  %s16_s10 = int_to_ptr.vmem [resolvable:$true] %s15_s10 }
   0x4   :  { %s206_s11 = scalar_lea.vmem %s16_s10, 8192  ;;  %p211_p1 = scmp.lt.s32.totalorder %s16_s10, %s16_s10 }
   0x5   :  { %p207_p0 = scmp.ne.s32.totalorder %s16_s10, %s206_s11  ;;  %p212_p2 = scmp.lt.s32.totalorder %s206_s11, %s206_s11 }
   0x7   :  { %p213_p3 = por %p212_p2, %p211_p1 }
   0x9   :  { %p214_p4 = pnand %p213_p3, %p207_p0 }
   0xb   :  { %217 = shalt.err (!%p214_p4)
}
   0xc   :  { %s265_s12 = smov 256   ;;  %s266_s13 = smov 16  }
   0xd   :  { %21 = dma.hbm_to_vmem [thread:$0]  %s293_s0, 8192, %s16_s10, [#allocation3], %s265_s12, %s265_s12, %s266_s13  }
   0xe   :  { %s267_s16 = smov [#allocation5]  }
   0xf   :  { %s28_s17 = sshll.u32 %s267_s16, 4  ;;  %s29_s17 = int_to_ptr.vmem [resolvable:$true] %s28_s17 }
  0x10   :  { %s226_s18 = scalar_lea.vmem %s29_s17, 256  ;;  %p231_p6 = scmp.lt.s32.totalorder %s29_s17, %s29_s17 }
  0x11   :  { %p227_p5 = scmp.ne.s32.totalorder %s29_s17, %s226_s18  ;;  %p232_p7 = scmp.lt.s32.totalorder %s226_s18, %s226_s18 }
  0x13   :  { %p233_p8 = por %p232_p7, %p231_p6 }
  0x15   :  { %p234_p9 = pnand %p233_p8, %p227_p5 }
  0x17   :  { %237 = shalt.err (!%p234_p9)
}
  0x18   :  { %31 = dma.hbm_to_vmem [thread:$0]  %s294_s1, 256, %s29_s17, [#allocation6]  }
  0x19   :  { %258 = dma.done.wait [#allocation3], 8192  }
  0x1a   :  { %259 = vsyncadd [#allocation3], 4294959104 }
  0x1b   :  { %260 = dma.done.wait [#allocation6], 256  }
  0x1c   :  { %261 = vsyncadd [#allocation6], 4294967040  ;;  %v71_v0 = vld [vmem:[#allocation2 + $0xf8] sm:$0xff]  ;;  %v70_v1 = vld [vmem:[#allocation2 + $0xf0] sm:$0xff]  ;;  %s268_s0 = smov [#allocation7]  }
  0x1d   :  { %v69_v2 = vld [vmem:[#allocation2 + $0xe8] sm:$0xff]  ;;  %104 = vmatprep.subr.mxu0 %v71_v0  ;;  %v68_v3 = vld [vmem:[#allocation2 + $0xe0] sm:$0xff]  ;;  %v67_v4 = vld [vmem:[#allocation2 + $0xd8] sm:$0xff]  ;;  %s183_s1 = sshll.u32 %s268_s0, 4  ;;  %s184_s1 = int_to_ptr.vmem [resolvable:$true] %s183_s1 }
  0x1e   :  { %105 = vmatpush1.msra.mxu0 %v70_v1  ;;  %v66_v5 = vld [vmem:[#allocation2 + $0xd0] sm:$0xff]  ;;  %v65_v6 = vld [vmem:[#allocation2 + $0xc8] sm:$0xff]  ;;  %v64_v7 = vld [vmem:[#allocation2 + $0xc0] sm:$0xff]  ;;  %s238_s21 = scalar_lea.vmem %s184_s1, 256  ;;  %p243_p11 = scmp.lt.s32.totalorder %s184_s1, %s184_s1 }
  0x1f   :  { %106 = vmatprep.subr.mxu0 %v69_v2  ;;  %v63_v8 = vld [vmem:[#allocation2 + $0xb8] sm:$0xff]  ;;  %v62_v9 = vld [vmem:[#allocation2 + $0xb0] sm:$0xff]  ;;  %v61_v10 = vld [vmem:[#allocation2 + $0xa8] sm:$0xff]  ;;  %p239_p10 = scmp.ne.s32.totalorder %s184_s1, %s238_s21  ;;  %p244_p12 = scmp.lt.s32.totalorder %s238_s21, %s238_s21 }
  0x20   :  { %107 = vmatpush1.msra.mxu0 %v68_v3  ;;  %v60_v11 = vld [vmem:[#allocation2 + $0xa0] sm:$0xff]  ;;  %v59_v12 = vld [vmem:[#allocation2 + $0x98] sm:$0xff]  ;;  %v58_v13 = vld [vmem:[#allocation2 + $0x90] sm:$0xff] }
  0x21   :  { %108 = vmatprep.subr.mxu0 %v67_v4  ;;  %v57_v14 = vld [vmem:[#allocation2 + $0x88] sm:$0xff]  ;;  %v56_v15 = vld [vmem:[#allocation2 + $0x80] sm:$0xff]  ;;  %v55_v16 = vld [vmem:[#allocation2 + $0x78] sm:$0xff]  ;;  %p245_p13 = por %p244_p12, %p243_p11 }
  0x22   :  { %109 = vmatpush1.msra.mxu0 %v66_v5  ;;  %v54_v17 = vld [vmem:[#allocation2 + $0x70] sm:$0xff]  ;;  %v53_v18 = vld [vmem:[#allocation2 + $0x68] sm:$0xff]  ;;  %v52_v19 = vld [vmem:[#allocation2 + $0x60] sm:$0xff] }
  0x23   :  { %110 = vmatprep.subr.mxu0 %v65_v6  ;;  %v51_v20 = vld [vmem:[#allocation2 + $0x58] sm:$0xff]  ;;  %v50_v21 = vld [vmem:[#allocation2 + $0x50] sm:$0xff]  ;;  %v49_v22 = vld [vmem:[#allocation2 + $0x48] sm:$0xff]  ;;  %p246_p0 = pnand %p245_p13, %p239_p10 }
  0x24   :  { %111 = vmatpush1.msra.mxu0 %v64_v7  ;;  %v48_v23 = vld [vmem:[#allocation2 + $0x40] sm:$0xff]  ;;  %v39_v24 = vld [vmem:[#allocation5 + $0x8] sm:$0xff]  ;;  %v47_v25 = vld [vmem:[#allocation2 + $0x38] sm:$0xff] }
  0x25   :  { %112 = vmatprep.subr.mxu0 %v63_v8  ;;  %168 = vmatprep.mubr.f32.mxu0 %v39_v24  ;;  %v46_v26 = vld [vmem:[#allocation2 + $0x30] sm:$0xff]  ;;  %v45_v27 = vld [vmem:[#allocation2 + $0x28] sm:$0xff]  ;;  %v44_v28 = vld [vmem:[#allocation2 + $0x20] sm:$0xff] }
  0x26   :  { %113 = vmatpush1.msra.mxu0 %v62_v9  ;;  %v43_v29 = vld [vmem:[#allocation2 + $0x18] sm:$0xff]  ;;  %v42_v30 = vld [vmem:[#allocation2 + $0x10] sm:$0xff]  ;;  %v41_v31 = vld [vmem:[#allocation2 + $0x8] sm:$0xff] }
  0x27   :  { %114 = vmatprep.subr.mxu0 %v61_v10  ;;  %v40_v32 = vld [vmem:[#allocation2] sm:$0xff]  ;;  %v103_v33 = vld [vmem:[#allocation2 + $0x1f8] sm:$0xff]  ;;  %v102_v34 = vld [vmem:[#allocation2 + $0x1f0] sm:$0xff] }
  0x28   :  { %115 = vmatpush1.msra.mxu0 %v60_v11  ;;  %v101_v35 = vld [vmem:[#allocation2 + $0x1e8] sm:$0xff]  ;;  %v100_v36 = vld [vmem:[#allocation2 + $0x1e0] sm:$0xff]  ;;  %v99_v37 = vld [vmem:[#allocation2 + $0x1d8] sm:$0xff] }
  0x29   :  { %116 = vmatprep.subr.mxu0 %v59_v12  ;;  %v98_v38 = vld [vmem:[#allocation2 + $0x1d0] sm:$0xff]  ;;  %v97_v39 = vld [vmem:[#allocation2 + $0x1c8] sm:$0xff]  ;;  %v96_v40 = vld [vmem:[#allocation2 + $0x1c0] sm:$0xff] }
  0x2a   :  { %117 = vmatpush1.msra.mxu0 %v58_v13  ;;  %v95_v41 = vld [vmem:[#allocation2 + $0x1b8] sm:$0xff]  ;;  %v94_v42 = vld [vmem:[#allocation2 + $0x1b0] sm:$0xff]  ;;  %v93_v43 = vld [vmem:[#allocation2 + $0x1a8] sm:$0xff] }
  0x2b   :  { %118 = vmatprep.subr.mxu0 %v57_v14  ;;  %v92_v44 = vld [vmem:[#allocation2 + $0x1a0] sm:$0xff]  ;;  %v91_v45 = vld [vmem:[#allocation2 + $0x198] sm:$0xff]  ;;  %v90_v46 = vld [vmem:[#allocation2 + $0x190] sm:$0xff] }
  0x2c   :  { %119 = vmatpush1.msra.mxu0 %v56_v15  ;;  %v89_v47 = vld [vmem:[#allocation2 + $0x188] sm:$0xff]  ;;  %v88_v48 = vld [vmem:[#allocation2 + $0x180] sm:$0xff]  ;;  %v87_v49 = vld [vmem:[#allocation2 + $0x178] sm:$0xff] }
  0x2d   :  { %120 = vmatprep.subr.mxu0 %v55_v16  ;;  %v86_v50 = vld [vmem:[#allocation2 + $0x170] sm:$0xff]  ;;  %v85_v51 = vld [vmem:[#allocation2 + $0x168] sm:$0xff]  ;;  %v84_v52 = vld [vmem:[#allocation2 + $0x160] sm:$0xff] }
  0x2e   :  { %121 = vmatpush1.msra.mxu0 %v54_v17  ;;  %v83_v53 = vld [vmem:[#allocation2 + $0x158] sm:$0xff]  ;;  %v82_v54 = vld [vmem:[#allocation2 + $0x150] sm:$0xff]  ;;  %v81_v55 = vld [vmem:[#allocation2 + $0x148] sm:$0xff] }
  0x2f   :  { %122 = vmatprep.subr.mxu0 %v53_v18  ;;  %v80_v56 = vld [vmem:[#allocation2 + $0x140] sm:$0xff]  ;;  %v79_v57 = vld [vmem:[#allocation2 + $0x138] sm:$0xff]  ;;  %v78_v58 = vld [vmem:[#allocation2 + $0x130] sm:$0xff] }
  0x30   :  { %123 = vmatpush1.msra.mxu0 %v52_v19  ;;  %v77_v59 = vld [vmem:[#allocation2 + $0x128] sm:$0xff]  ;;  %v76_v60 = vld [vmem:[#allocation2 + $0x120] sm:$0xff]  ;;  %v75_v61 = vld [vmem:[#allocation2 + $0x118] sm:$0xff] }
  0x31   :  { %124 = vmatprep.subr.mxu0 %v51_v20  ;;  %v74_v62 = vld [vmem:[#allocation2 + $0x110] sm:$0xff]  ;;  %v73_v63 = vld [vmem:[#allocation2 + $0x108] sm:$0xff]  ;;  %v72_v0 = vld [vmem:[#allocation2 + $0x100] sm:$0xff] }
  0x32   :  { %125 = vmatpush1.msra.mxu0 %v50_v21  ;;  %v38_v1 = vld [vmem:[#allocation5] sm:$0xff] }
  0x33   :  { %126 = vmatprep.subr.mxu0 %v49_v22 }
  0x34   :  { %127 = vmatpush1.msra.mxu0 %v48_v23 }
  0x35   :  { %128 = vmatprep.subr.mxu0 %v47_v25 }
  0x36   :  { %129 = vmatpush1.msra.mxu0 %v46_v26 }
  0x37   :  { %130 = vmatprep.subr.mxu0 %v45_v27 }
  0x38   :  { %131 = vmatpush1.msra.mxu0 %v44_v28 }
  0x39   :  { %132 = vmatprep.subr.mxu0 %v43_v29 }
  0x3a   :  { %133 = vmatpush1.msra.mxu0 %v42_v30 }
  0x3b   :  { %134 = vmatprep.subr.mxu0 %v41_v31 }
  0x3c   :  { %135 = vmatpush1.msra.mxu0 %v40_v32 }
  0x3d   :  { %136 = vmatprep.subr.mxu0 %v103_v33 }
  0x3e   :  { %137 = vmatpush2.msra.mxu0 %v102_v34 }
  0x3f   :  { %138 = vmatprep.subr.mxu0 %v101_v35 }
  0x40   :  { %139 = vmatpush2.msra.mxu0 %v100_v36 }
  0x41   :  { %140 = vmatprep.subr.mxu0 %v99_v37 }
  0x42   :  { %141 = vmatpush2.msra.mxu0 %v98_v38 }
  0x43   :  { %142 = vmatprep.subr.mxu0 %v97_v39 }
  0x44   :  { %143 = vmatpush2.msra.mxu0 %v96_v40 }
  0x45   :  { %144 = vmatprep.subr.mxu0 %v95_v41 }
  0x46   :  { %145 = vmatpush2.msra.mxu0 %v94_v42 }
  0x47   :  { %146 = vmatprep.subr.mxu0 %v93_v43 }
  0x48   :  { %147 = vmatpush2.msra.mxu0 %v92_v44 }
  0x49   :  { %148 = vmatprep.subr.mxu0 %v91_v45 }
  0x4a   :  { %149 = vmatpush2.msra.mxu0 %v90_v46 }
  0x4b   :  { %150 = vmatprep.subr.mxu0 %v89_v47 }
  0x4c   :  { %151 = vmatpush2.msra.mxu0 %v88_v48 }
  0x4d   :  { %152 = vmatprep.subr.mxu0 %v87_v49 }
  0x4e   :  { %153 = vmatpush2.msra.mxu0 %v86_v50 }
  0x4f   :  { %154 = vmatprep.subr.mxu0 %v85_v51 }
  0x50   :  { %155 = vmatpush2.msra.mxu0 %v84_v52 }
  0x51   :  { %156 = vmatprep.subr.mxu0 %v83_v53 }
  0x52   :  { %157 = vmatpush2.msra.mxu0 %v82_v54 }
  0x53   :  { %158 = vmatprep.subr.mxu0 %v81_v55 }
  0x54   :  { %159 = vmatpush2.msra.mxu0 %v80_v56 }
  0x55   :  { %160 = vmatprep.subr.mxu0 %v79_v57 }
  0x56   :  { %161 = vmatpush2.msra.mxu0 %v78_v58 }
  0x57   :  { %162 = vmatprep.subr.mxu0 %v77_v59 }
  0x58   :  { %163 = vmatpush2.msra.mxu0 %v76_v60 }
  0x59   :  { %164 = vmatprep.subr.mxu0 %v75_v61 }
  0x5a   :  { %165 = vmatpush2.msra.mxu0 %v74_v62 }
  0x5b   :  { %166 = vmatprep.subr.mxu0 %v73_v63 }
  0x5c   :  { %167 = vmatpush2.msra.mxu0 %v72_v0 }
  0x5d   :  { %169 = vmatmul.mubr.f32.vlgmr.msra.gmra.mxu0 %v38_v1 }
 0x11d   :  { %v170_v2 = vpop.f32.mrf.mxu0 }
 0x11e   :  { %175 = vst [vmem:[#allocation7] sm:$0xff] %v170_v2 }
 0x11f   :  { %v172_v3 = vpop.f32.mrf.mxu0 }
 0x120   :  { %176 = vst [vmem:[#allocation7 + $0x8] sm:$0xff] %v172_v3 }
 0x121   :  { %249 = shalt.err (!%p246_p0)
}
 0x122   :  { %186 = dma.vmem_to_hbm [thread:$0]  %s184_s1, 256, %s295_s2, [#allocation4]  }
 0x123   :  { %262 = dma.done.wait [#allocation4], 256  }
 0x124   :  { %263 = vsyncadd [#allocation4], 4294967040 }
 0x125   :  { %190 = vsyncpa [#allocation3], 1 }
 0x126   :  { %191 = vsyncpa [#allocation6], 1 }
 0x127   :  { %192 = vsyncpa [#allocation4], 1 }

</bundles_post_ra>
